<compile_context>
chip_gen: v7x
topology: tpu7x:2x2x1
jax: 0.10.0
libtpu: 0.0.40
codegen_flags: <defaults>
</compile_context>

<pallas_src>
from functools import partial

import jax
import jax.numpy as jnp
from jax.experimental import pallas as pl
from jax.experimental.pallas import tpu as pltpu

_LN_EPS = 1e-5  # PyTorch nn.LayerNorm default


def _round_up(x, m):
    return (x + m - 1) // m * m


def _vmem_capacity_bytes():
    try:
        return int(pltpu.get_tpu_info().vmem_capacity_bytes)
    except Exception:
        return 64 << 20  # conservative (v7x) fallback


def _patch_embed_kernel(x_ref, w_ref, p_ref, o_ref, *, e_true, e_pad):
    # x_ref: (TM, Kp) bf16/f32, w_ref: (Kp, Ep) bf16/f32, p_ref: (3, Ep) f32 [bias; gamma; beta]
    # o_ref: (TM, Ep) out dtype
    y = jnp.dot(x_ref[...], w_ref[...], preferred_element_type=jnp.float32)
    p = p_ref[...]
    y = y + p[0:1, :]  # bias, broadcast over rows (padded cols of bias are 0 -> y==0 there)

    # Two-pass LayerNorm over the *true* embedding width E.
    # Padded weight/bias columns are exactly 0 in y, so:
    #   sum(y)            over Ep cols == sum over the true E cols
    #   sum((y-mean)^2)   over Ep cols == sum over true E cols + (Ep-E)*mean^2   (compensated)
    inv_e = 1.0 / e_true
    mean = jnp.sum(y, axis=-1, keepdims=True) * inv_e
    d = y - mean
    ssq = jnp.sum(d * d, axis=-1, keepdims=True)
    if e_pad > e_true:
        ssq = ssq - (e_pad - e_true) * mean * mean
    var = jnp.maximum(ssq * inv_e, 0.0)  # biased variance (PyTorch LayerNorm)
    y_hat = d * jax.lax.rsqrt(var + _LN_EPS)

    # gamma/beta are 0 in padded columns -> padded output columns are 0 (sliced off by wrapper).
    o_ref[...] = (y_hat * p[1:2, :] + p[2:3, :]).astype(o_ref.dtype)


def _choose_tm(m, kp, ep, in_itemsize, out_itemsize, resident_bytes, vmem_cap):
    """M-tile selection.

    Budget = ~75% of physical VMEM minus the double-buffered resident weight/params and a
    small slack; the streamed (TM, Kp) input and (TM, Ep) output tiles (2x buffered each)
    must fit the remainder.  TM is additionally capped so the grid has >=2 steps (v7x
    megacore) and rounded to an MXU/lane-friendly multiple.
    """
    limit = int(vmem_cap * 0.75)
    budget = limit - resident_bytes - (2 << 20)  # slack for internal scratch / semaphores
    per_row = 2 * (kp * in_itemsize + ep * out_itemsize)
    tm = budget // max(per_row, 1)

    hard_cap = 1024 if vmem_cap >= (100 << 20) else 512   # bigger tiles on 128-MiB parts
    split_cap = _round_up(max(8, -(-m // 2)), 8)           # >=2 grid steps when M allows it
    tm = max(8, min(tm, hard_cap, split_cap))

    if tm >= 256:
        tm = (tm // 256) * 256
    elif tm >= 128:
        tm = 128
    else:
        tm = max(8, (tm // 8) * 8)
    return int(tm), limit


def patch_embed_forward(x, conv_w, conv_b, ln_gamma, ln_beta, patch_size, *, use_bf16=True):
    """x: (B, C, H, W).  conv_w: (E, C, ph, pw).  Returns ((B, N, E), (H//ph, W//pw))."""
    B, C, H, W = x.shape
    ph, pw = patch_size
    assert H % ph == 0 and W % pw == 0
    Hp, Wp = H // ph, W // pw
    N = Hp * Wp
    E = conv_w.shape[0]
    K = C * ph * pw
    M = B * N

    compute_dtype = jnp.bfloat16 if use_bf16 else x.dtype

    # --- glue: non-overlapping patch extraction, feature order (C, ph, pw) matching Conv2d ---
    # Cast to bf16 first so the HBM relayout (and the kernel's streamed input) is half-width.
    # TODO(synk): fold this relayout into the kernel (grid over (B, Hp) row strips) to remove
    # the extra HBM read+write entirely for very large images.
    xq = x.astype(compute_dtype)
    xp = xq.reshape(B, C, Hp, ph, Wp, pw)
    xp = jnp.transpose(xp, (0, 2, 4, 1, 3, 5)).reshape(M, K)

    # --- lane alignment: pad K / E to multiples of 128 only when needed ---
    Kp = K if (K < 128 or K % 128 == 0) else _round_up(K, 128)
    Ep = E if (E < 128 or E % 128 == 0) else _round_up(E, 128)

    w_mat = conv_w.reshape(E, K).T.astype(compute_dtype)                  # (K, E)
    params = jnp.stack([conv_b, ln_gamma, ln_beta]).astype(jnp.float32)   # (3, E)

    if Kp != K:
        xp = jnp.pad(xp, ((0, 0), (0, Kp - K)))
        w_mat = jnp.pad(w_mat, ((0, Kp - K), (0, 0)))
    if Ep != E:
        w_mat = jnp.pad(w_mat, ((0, 0), (0, Ep - E)))
        params = jnp.pad(params, ((0, 0), (0, Ep - E)))

    # --- VMEM budget: resident (double-buffered) weight + params slab ---
    in_isz = jnp.dtype(compute_dtype).itemsize
    out_isz = jnp.dtype(x.dtype).itemsize
    resident = 2 * Kp * Ep * in_isz + 2 * 8 * Ep * 4
    # TODO(synk): for very large K*Ep (video / 32x32 patches) add a K grid axis ("arbitrary")
    # with an f32 accumulator instead of forcing tiny TM.
    vmem_cap = _vmem_capacity_bytes()
    TM, vmem_limit = _choose_tm(M, Kp, Ep, in_isz, out_isz, resident, vmem_cap)

    grid_m = pl.cdiv(M, TM)  # partial edge block -> masked writes; no host-side M pad / slice

    out = pl.pallas_call(
        partial(_patch_embed_kernel, e_true=float(E), e_pad=float(Ep)),
        out_shape=jax.ShapeDtypeStruct((M, Ep), x.dtype),
        grid=(grid_m,),
        in_specs=[
            pl.BlockSpec((TM, Kp), lambda i: (i, 0)),   # patches: streamed over M
            pl.BlockSpec((Kp, Ep), lambda i: (0, 0)),   # weight: VMEM-resident
            pl.BlockSpec((3, Ep), lambda i: (0, 0)),    # [bias; gamma; beta]: VMEM-resident
        ],
        out_specs=pl.BlockSpec((TM, Ep), lambda i: (i, 0)),
        compiler_params=pltpu.CompilerParams(
            dimension_semantics=("parallel",),
            vmem_limit_bytes=vmem_limit,
        ),
    )(xp, w_mat, params)

    if Ep != E:
        out = out[:, :E]
    return out.reshape(B, N, E), (Hp, Wp)


def _reference(x, conv_w, conv_b, ln_gamma, ln_beta, patch_size):
    """Pure-JAX f32 reference matching the PyTorch module."""
    B, C, H, W = x.shape
    ph, pw = patch_size
    Hp, Wp = H // ph, W // pw
    E = conv_w.shape[0]
    xp = x.reshape(B, C, Hp, ph, Wp, pw)
    xp = jnp.transpose(xp, (0, 2, 4, 1, 3, 5)).reshape(B * Hp * Wp, C * ph * pw)
    y = xp @ conv_w.reshape(E, -1).T + conv_b[None, :]
    mean = y.mean(-1, keepdims=True)
    var = ((y - mean) ** 2).mean(-1, keepdims=True)
    y = (y - mean) / jnp.sqrt(var + _LN_EPS) * ln_gamma[None, :] + ln_beta[None, :]
    return y.reshape(B, Hp * Wp, E)


if __name__ == "__main__":
    # Small shapes consistent with the module: img_size=16, patch_size=8, in_chans=4, embed_dim=32
    B, C, H, W = 2, 4, 16, 16
    ph, pw = 8, 8
    E = 32

    key = jax.random.PRNGKey(0)
    kx, kw, kb = jax.random.split(key, 3)

    x = jax.random.normal(kx, (B, C, H, W), dtype=jnp.float32)
    fan_in = C * ph * pw
    conv_w = jax.random.normal(kw, (E, C, ph, pw), dtype=jnp.float32) / jnp.sqrt(fan_in)
    conv_b = jax.random.normal(kb, (E,), dtype=jnp.float32) * 0.01
    ln_gamma = jnp.ones((E,), dtype=jnp.float32)
    ln_beta = jnp.zeros((E,), dtype=jnp.float32)

    out, (Hp, Wp) = patch_embed_forward(x, conv_w, conv_b, ln_gamma, ln_beta, (ph, pw))
    out = jax.block_until_ready(out)

    assert out.shape == (B, (H // ph) * (W // pw), E), out.shape
    assert (Hp, Wp) == (H // ph, W // pw)

    ref = _reference(x, conv_w, conv_b, ln_gamma, ln_beta, (ph, pw))
    max_err = float(jnp.abs(out - ref).max())
    # bf16 MXU operands with f32 accumulation: ~1e-2-scale tolerance.
    assert jnp.allclose(out, ref, atol=5e-2, rtol=5e-2), max_err

    print("KERNEL_OK")
</pallas_src>

<mosaic_0001>
module attributes {stable_mosaic.version = 11 : i64} {
  func.func @_patch_embed_kernel(%arg0: i32, %arg1: memref<8x256xbf16, #tpu.memory_space<vmem>>, %arg2: memref<256x32xbf16, #tpu.memory_space<vmem>>, %arg3: memref<3x32xf32, #tpu.memory_space<vmem>>, %arg4: memref<8x32xf32, #tpu.memory_space<vmem>>) attributes {dimension_semantics = [#tpu.dimension_semantics<parallel>], iteration_bounds = array<i64: 1>, scalar_prefetch = 0 : i64, scratch_operands = 0 : i64, tpu.core_type = #tpu.core_type<tc>, window_params = [{transform_indices = @transform_0, window_bounds = array<i64: 8, 256>}, {pipeline_mode = #tpu.pipeline_mode<synchronous>, transform_indices = @transform_1, window_bounds = array<i64: 256, 32>}, {pipeline_mode = #tpu.pipeline_mode<synchronous>, transform_indices = @transform_2, window_bounds = array<i64: 3, 32>}, {transform_indices = @transform_3, window_bounds = array<i64: 8, 32>}]} {
    %c0 = arith.constant 0 : index
    %c0_0 = arith.constant 0 : index
    %0 = vector.load %arg1[%c0, %c0_0] : memref<8x256xbf16, #tpu.memory_space<vmem>>, vector<8x256xbf16>
    %c0_1 = arith.constant 0 : index
    %c0_2 = arith.constant 0 : index
    %1 = vector.load %arg2[%c0_1, %c0_2] : memref<256x32xbf16, #tpu.memory_space<vmem>>, vector<256x32xbf16>
    %cst = arith.constant dense<0.000000e+00> : vector<8x32xf32>
    %2 = tpu.matmul %0, %1, %cst {dimension_numbers = #tpu.dot_dimension_numbers<[1], [0], [0], [1], [0, 0, 1, 1], [], []>} : vector<8x256xbf16>, vector<256x32xbf16>, vector<8x32xf32> -> vector<8x32xf32>
    %c0_3 = arith.constant 0 : index
    %c0_4 = arith.constant 0 : index
    %3 = vector.load %arg3[%c0_3, %c0_4] : memref<3x32xf32, #tpu.memory_space<vmem>>, vector<3x32xf32>
    %4 = vector.extract_strided_slice %3 {offsets = [0, 0], sizes = [1, 32], strides = [1, 1]} : vector<3x32xf32> to vector<1x32xf32>
    %5 = vector.broadcast %4 : vector<1x32xf32> to vector<8x32xf32>
    %6 = arith.addf %2, %5 : vector<8x32xf32>
    %cst_5 = arith.constant dense<0.000000e+00> : vector<8xf32>
    %7 = vector.multi_reduction <add>, %6, %cst_5 [1] : vector<8x32xf32> to vector<8xf32>
    %8 = vector.shape_cast %7 : vector<8xf32> to vector<8x1xf32>
    %cst_6 = arith.constant 3.125000e-02 : f32
    %9 = vector.broadcast %cst_6 : f32 to vector<8x1xf32>
    %10 = arith.mulf %8, %9 : vector<8x1xf32>
    %11 = vector.broadcast %10 : vector<8x1xf32> to vector<8x32xf32>
    %12 = arith.subf %6, %11 : vector<8x32xf32>
    %13 = arith.mulf %12, %12 : vector<8x32xf32>
    %cst_7 = arith.constant dense<0.000000e+00> : vector<8xf32>
    %14 = vector.multi_reduction <add>, %13, %cst_7 [1] : vector<8x32xf32> to vector<8xf32>
    %15 = vector.shape_cast %14 : vector<8xf32> to vector<8x1xf32>
    %cst_8 = arith.constant 3.125000e-02 : f32
    %16 = vector.broadcast %cst_8 : f32 to vector<8x1xf32>
    %17 = arith.mulf %15, %16 : vector<8x1xf32>
    %cst_9 = arith.constant 0.000000e+00 : f32
    %18 = vector.broadcast %cst_9 : f32 to vector<8x1xf32>
    %19 = arith.maximumf %17, %18 : vector<8x1xf32>
    %cst_10 = arith.constant 9.99999974E-6 : f32
    %20 = vector.broadcast %cst_10 : f32 to vector<8x1xf32>
    %21 = arith.addf %19, %20 : vector<8x1xf32>
    %22 = math.rsqrt %21 : vector<8x1xf32>
    %23 = vector.broadcast %22 : vector<8x1xf32> to vector<8x32xf32>
    %24 = arith.mulf %12, %23 : vector<8x32xf32>
    %25 = vector.extract_strided_slice %3 {offsets = [1, 0], sizes = [1, 32], strides = [1, 1]} : vector<3x32xf32> to vector<1x32xf32>
    %26 = vector.broadcast %25 : vector<1x32xf32> to vector<8x32xf32>
    %27 = arith.mulf %24, %26 : vector<8x32xf32>
    %28 = vector.extract_strided_slice %3 {offsets = [2, 0], sizes = [1, 32], strides = [1, 1]} : vector<3x32xf32> to vector<1x32xf32>
    %29 = vector.broadcast %28 : vector<1x32xf32> to vector<8x32xf32>
    %30 = arith.addf %27, %29 : vector<8x32xf32>
    %c0_11 = arith.constant 0 : index
    %c0_12 = arith.constant 0 : index
    %31 = vector.load %arg4[%c0_11, %c0_12] : memref<8x32xf32, #tpu.memory_space<vmem>>, vector<8x32xf32>
    tpu.vector_store %arg4[%c0_11, %c0_12], %30 {strides = array<i32>} : memref<8x32xf32, #tpu.memory_space<vmem>>, vector<8x32xf32>,
    return
  }
  func.func @transform_0(%arg0: i32) -> (i32, i32) {
    %c0_i32 = arith.constant 0 : i32
    %c0_i32_0 = arith.constant 0 : i32
    return %arg0, %c0_i32 : i32, i32
  }
  func.func @transform_1(%arg0: i32) -> (i32, i32) {
    %c0_i32 = arith.constant 0 : i32
    %c0_i32_0 = arith.constant 0 : i32
    %c0_i32_1 = arith.constant 0 : i32
    return %c0_i32, %c0_i32_0 : i32, i32
  }
  func.func @transform_2(%arg0: i32) -> (i32, i32) {
    %c0_i32 = arith.constant 0 : i32
    %c0_i32_0 = arith.constant 0 : i32
    %c0_i32_1 = arith.constant 0 : i32
    return %c0_i32, %c0_i32_0 : i32, i32
  }
  func.func @transform_3(%arg0: i32) -> (i32, i32) {
    %c0_i32 = arith.constant 0 : i32
    %c0_i32_0 = arith.constant 0 : i32
    return %arg0, %c0_i32 : i32, i32
  }
}

</mosaic_0001>

<bundles_post_ra>
// kernel: tpu_custom_call.1
= control target key start
LH: loop header
LB: loop body
LE: loop exit
PB: predicated region body
PF: predicated region fallthrough
CT: control target
= control target key end

     0   :  { %s412_s0 = inlined_call_operand.vmem [shape: bf16[8,256], index: 0, kind: input, shape index: {}]   ;;  %s413_s1 = inlined_call_operand.vmem [shape: bf16[256,32], index: 1, kind: input, shape index: {}]   ;;  %s414_s2 = inlined_call_operand.vmem [shape: f32[3,32], index: 2, kind: input, shape index: {}]   ;;  %s415_s3 = inlined_call_operand.hbm [shape: f32[8,32], index: 3, kind: output, shape index: {}]  }
   0x1   :  { %v278_v0 = vld [vmem:[%s413_s1 + $0x40] sm:$0xff]   ;;  %v280_v2 = vld [vmem:[%s413_s1 + $0x48] sm:$0xff]   ;;  %v282_v4 = vld [vmem:[%s413_s1 + $0x50] sm:$0xff]  }
   0x2   :  { %v279_v1 = vld [vmem:[%s413_s1] sm:$0xff]   ;;  %255 = vmatprep.subr.bf16.mxu0 %v278_v0  ;;  %v281_v3 = vld [vmem:[%s413_s1 + $0x8] sm:$0xff]   ;;  %v283_v5 = vld [vmem:[%s413_s1 + $0x10] sm:$0xff]  }
   0x3   :  { %256 = vmatpush3.bf16.msra.mxu0 %v279_v1  ;;  %v284_v6 = vld [vmem:[%s413_s1 + $0x58] sm:$0xff]   ;;  %v286_v8 = vld [vmem:[%s413_s1 + $0x60] sm:$0xff]   ;;  %v288_v10 = vld [vmem:[%s413_s1 + $0x68] sm:$0xff]  }
   0x4   :  { %257 = vmatprep.subr.bf16.mxu0 %v280_v2  ;;  %v285_v7 = vld [vmem:[%s413_s1 + $0x18] sm:$0xff]   ;;  %v287_v9 = vld [vmem:[%s413_s1 + $0x20] sm:$0xff]  }
   0x5   :  { %v16_v11 = vld [vmem:[%s412_s0] sm:$0xff] }
   0x7   :  { %258 = vmatpush3.bf16.msra.mxu0 %v281_v3 }
   0x8   :  { %259 = vmatprep.subr.bf16.mxu0 %v282_v4 }
   0xb   :  { %260 = vmatpush3.bf16.msra.mxu0 %v283_v5 }
   0xc   :  { %261 = vmatprep.subr.bf16.mxu0 %v284_v6 }
   0xf   :  { %262 = vmatpush3.bf16.msra.mxu0 %v285_v7 }
  0x10   :  { %263 = vmatprep.subr.bf16.mxu0 %v286_v8 }
  0x11   :  { %8 = vsyncpa [#allocation3], 0  ;;  %v238_v12 = vcombine.high %v16_v11, %v16_v11  ;;  %v289_v13 = vld [vmem:[%s413_s1 + $0x28] sm:$0xff]   ;;  %v290_v14 = vld [vmem:[%s413_s1 + $0x70] sm:$0xff]   ;;  %v237_v18 = vcombine.low %v16_v11, %v16_v11  ;;  %v50_v19 = vlaneseq  ;;  %vm197_vm0 = vcmask 261120  }
  0x12   :  { %v291_v15 = vld [vmem:[%s413_s1 + $0x30] sm:$0xff]   ;;  %v292_v16 = vld [vmem:[%s413_s1 + $0x78] sm:$0xff]   ;;  %v49_v22 = vld [vmem:[%s414_s2] sm:$0x7] }
  0x13   :  { %264 = vmatpush3.bf16.msra.mxu0 %v287_v9  ;;  %189 = vmatprep.mubr.bf16.mxu0 %v238_v12  ;;  %v293_v17 = vld [vmem:[%s413_s1 + $0x38] sm:$0xff]   ;;  %v51_v20 = vshrl.u32 %v50_v19, 7  ;;  %s322_s1 = smov [#allocation2]  }
  0x14   :  { %265 = vmatprep.subr.bf16.mxu0 %v288_v10  ;;  %s229_s2 = sshll.u32 %s322_s1, 4  ;;  %s230_s2 = int_to_ptr.vmem [resolvable:$true] %s229_s2 }
  0x15   :  { %v52_v21 = vsub.s32 0, %v51_v20  ;;  %v214_v40 = vsub.s32 1, %v51_v20  ;;  %v219_v41 = vsub.s32 2, %v51_v20  ;;  %s298_s20 = scalar_lea.vmem %s230_s2, 128  ;;  %p303_p1 = scmp.lt.s32.totalorder %s230_s2, %s230_s2 }
  0x16   :  { %p299_p0 = scmp.ne.s32.totalorder %s230_s2, %s298_s20  ;;  %p304_p2 = scmp.lt.s32.totalorder %s298_s20, %s298_s20 }
  0x17   :  { %266 = vmatpush3.bf16.msra.mxu0 %v289_v13  ;;  %v53_v24 = vrot.slane %v49_v22, %v52_v21  ;;  %v215_v42 = vrot.slane %v49_v22, %v214_v40  ;;  %v220_v45 = vrot.slane %v49_v22, %v219_v41 }
  0x18   :  { %267 = vmatprep.subr.bf16.mxu0 %v290_v14  ;;  %p305_p3 = por %p304_p2, %p303_p1 }
  0x1a   :  { %p306_p4 = pnand %p305_p3, %p299_p0 }
  0x1b   :  { %268 = vmatpush3.bf16.msra.mxu0 %v291_v15 }
  0x1c   :  { %269 = vmatprep.subr.bf16.mxu0 %v292_v16 }
  0x1f   :  { %270 = vmatpush3.bf16.msra.mxu0 %v293_v17 }
  0x22   :  { %190 = vmatmul.mubr.bf16.vlgmr.msra.gmra.mrb[0].mxu0 %v237_v18 }
  0xf5   :  { %v271_v23 = vpop.f32.mrb[0].mxu0 }
  0xf6   :  { %v272_v25 = vpop.f32.mrb[1].mxu0 }
  0xf7   :  { %v273_v26 = vadd.f32 %v272_v25, %v271_v23  ;;  %v274_v27 = vpop.f32.mrb[2].mxu0 }
  0xf8   :  { %v275_v28 = vpop.f32.mrb[3].mxu0 }
  0xf9   :  { %v192_v29 = vadd.f32 %v273_v26, %v53_v24 }
  0xfb   :  { %v198_v30 = vsel %vm197_vm0, %v192_v29, 0.0 }
  0xfc   :  { %199 = vadd.xlane.f32.xlu0 %v198_v30 }
 0x189   :  { %v200_v31 = vpop.xlane.xlu0 %199 }
 0x18a   :  { %v201_v32 = vmul.f32 0.03125, %v200_v31 }
 0x18c   :  { %v202_v33 = vsub.f32 %v192_v29, %v201_v32 }
 0x18e   :  { %v203_v34 = vmul.f32 %v202_v33, %v202_v33 }
 0x190   :  { %v204_v35 = vsel %vm197_vm0, %v203_v34, 0.0 }
 0x191   :  { %205 = vadd.xlane.f32.xlu0 %v204_v35 }
 0x21e   :  { %v206_v36 = vpop.xlane.xlu0 %205 }
 0x21f   :  { %v207_v37 = vmul.f32 0.03125, %v206_v36 }
 0x221   :  { %v208_v38 = vmax.f32 %v207_v37, 0.0 }
 0x223   :  { %v209_v39 = vadd.f32 1e-05, %v208_v38 }
 0x225   :  { %296 = vrsqrt.f32 %v209_v39 }
 0x22f   :  { %v297_v43 = vpop.eup %296 }
 0x230   :  { %v211_v44 = vmul.f32 %v297_v43, %v202_v33 }
 0x232   :  { %v216_v46 = vmul.f32 %v215_v42, %v211_v44 }
 0x234   :  { %v221_v47 = vadd.f32 %v220_v45, %v216_v46 }
 0x236   :  { %222 = vst.msk [vmem:[#allocation2] sm:$0xff] %vm197_vm0, %v221_v47 }
 0x237   :  { %309 = shalt.err (!%p306_p4)
}
 0x238   :  { %s310_s23 = scalar_lea.hbm %s415_s3, 128 }
 0x239   :  { %p311_p5 = scmp.ne.s32.totalorder %s415_s3, %s310_s23  ;;  %p314_p6 = scmp.lt.u32.totalorder %s310_s23, %s415_s3 }
 0x23b   :  { %p316_p7 = pnand %p314_p6, %p311_p5 }
 0x23d   :  { %319 = shalt.err (!%p316_p7)
}
 0x23e   :  { %232 = dma.vmem_to_hbm [thread:$0]  %s230_s2, 128, %s415_s3, [#allocation3]  }
 0x23f   :  { %320 = dma.done.wait [#allocation3], 128  }
 0x240   :  { %321 = vsyncadd [#allocation3], 4294967168 }
 0x241   :  { %236 = vsyncpa [#allocation3], 1 }

</bundles_post_ra>
